<compile_context>
chip_gen: v7x
topology: tpu7x:2x2x1
jax: 0.10.0
libtpu: 0.0.40
codegen_flags: <defaults>
</compile_context>

<pallas_src>
import functools

import jax
import jax.numpy as jnp
from jax.experimental import pallas as pl
from jax.experimental.pallas import tpu as pltpu


# ---------------------------------------------------------------------------
# Kernel 1: streaming global average pool.  grid = (N/bn, C/tc, HW/thw)
# ---------------------------------------------------------------------------
def _global_avg_pool_kernel(x_ref, o_ref, acc_ref, *, hw_total, tile_hw,
                            needs_mask):
    # x_ref:   (bn, tile_c, tile_hw)  one HW tile of bn images / tile_c chans
    # o_ref:   (bn, tile_c)           per-image channel means (f32)
    # acc_ref: (bn, tile_c) f32       running spatial sum, resident across HW
    hw = pl.program_id(2)
    last = pl.num_programs(2) - 1

    @pl.when(hw == 0)
    def _():
        acc_ref[...] = jnp.zeros_like(acc_ref)

    x = x_ref[...].astype(jnp.float32)

    if needs_mask:
        # Plain sum on all full tiles; masking only on the final (ragged) tile.
        @pl.when(hw != last)
        def _():
            acc_ref[...] += jnp.sum(x, axis=-1)

        @pl.when(hw == last)
        def _():
            lane = jax.lax.broadcasted_iota(jnp.int32, (1, 1, tile_hw), 2)
            valid = (hw * tile_hw + lane) < hw_total
            acc_ref[...] += jnp.sum(jnp.where(valid, x, 0.0), axis=-1)
    else:
        acc_ref[...] += jnp.sum(x, axis=-1)

    @pl.when(hw == last)
    def _():
        o_ref[...] = (acc_ref[...] * (1.0 / float(hw_total))).astype(o_ref.dtype)


# ---------------------------------------------------------------------------
# Kernel 2: batched SE MLP over the pooled means (one block, one grid step).
# ---------------------------------------------------------------------------
def _se_mlp_kernel(avg_ref, w1t_ref, w2t_ref, o_ref):
    # avg_ref: (N, C) f32; w1t_ref: (C, Cr); w2t_ref: (Cr, C); o_ref: (N, C)
    avg = avg_ref[...].astype(jnp.float32)
    h = jnp.dot(avg, w1t_ref[...].astype(jnp.float32),
                preferred_element_type=jnp.float32)
    h = jnp.maximum(h, 0.0)                                   # ReLU
    out = jnp.dot(h, w2t_ref[...].astype(jnp.float32),
                  preferred_element_type=jnp.float32)
    o_ref[...] = jax.nn.sigmoid(out).astype(o_ref.dtype)


def _largest_divisor_le(n, cap):
    cap = max(1, min(int(n), int(cap)))
    for d in range(cap, 0, -1):
        if n % d == 0:
            return d
    return 1


def channel_attention(x, w1, w2, *, tile_hw=None, vmem_budget_bytes=16 << 20):
    """x: (N, C, H, W); w1: (C//r, C, 1, 1); w2: (C, C//r, 1, 1).
    Returns (N, C, 1, 1), matching the PyTorch module's forward."""
    N, C, H, W = x.shape
    Cr = w1.shape[0]
    HW = H * W
    itemsize = x.dtype.itemsize

    x_flat = x.reshape(N, C, HW)
    w1t = w1.reshape(Cr, C).T          # (C, Cr)
    w2t = w2.reshape(C, Cr).T          # (Cr, C)

    # ---- HW tile (lanes): >=512-lane sweet spot, from a portable budget ----
    if tile_hw is None:
        max_lanes = max(128, vmem_budget_bytes // (2 * C * itemsize))
        if HW <= max_lanes:
            tile_hw = HW
        else:
            tile_hw = max(512, (max_lanes // 128) * 128)
            if tile_hw >= HW:
                tile_hw = HW
    else:
        tile_hw = int(tile_hw)
        if tile_hw >= HW:
            tile_hw = HW
        else:
            tile_hw = max(128, (tile_hw // 128) * 128)
            if tile_hw >= HW:
                tile_hw = HW

    n_hw = pl.cdiv(HW, tile_hw)
    needs_mask = (HW % tile_hw) != 0

    # ---- batch block: cut grid-step overhead for small feature maps --------
    bn_cap = max(1, vmem_budget_bytes // (2 * C * tile_hw * itemsize))
    bn = _largest_divisor_le(N, bn_cap)
    n_b = N // bn

    # ---- channel block: keep >=2 parallel grid steps for v7x's 2 TCs -------
    if n_b >= 2 or C % 256 != 0:
        tile_c = C
    else:
        tile_c = C // 2            # multiple of 128, keeps lane-dense output
    n_c = C // tile_c

    # ---- VMEM limit from the actual working set (portable to v7x 64 MiB) ---
    x_ws = 2 * bn * tile_c * tile_hw * itemsize        # double-buffered input
    misc = 3 * bn * tile_c * 4                         # acc + output buffers
    vmem_limit = int(min(max(x_ws + misc + (4 << 20), 16 << 20), 56 << 20))

    pool_kernel = functools.partial(
        _global_avg_pool_kernel,
        hw_total=HW, tile_hw=tile_hw, needs_mask=needs_mask)

    pooled = pl.pallas_call(
        pool_kernel,
        out_shape=jax.ShapeDtypeStruct((N, C), jnp.float32),
        grid=(n_b, n_c, n_hw),
        in_specs=[
            pl.BlockSpec((bn, tile_c, tile_hw), lambda n, c, hw: (n, c, hw)),
        ],
        out_specs=pl.BlockSpec((bn, tile_c), lambda n, c, hw: (n, c)),
        scratch_shapes=[pltpu.VMEM((bn, tile_c), jnp.float32)],
        compiler_params=pltpu.CompilerParams(
            dimension_semantics=("parallel", "parallel", "arbitrary"),
            vmem_limit_bytes=vmem_limit,
        ),
    )(x_flat)

    out = pl.pallas_call(
        _se_mlp_kernel,
        out_shape=jax.ShapeDtypeStruct((N, C), x.dtype),
        grid=(1,),
        in_specs=[
            pl.BlockSpec((N, C), lambda i: (0, 0)),
            pl.BlockSpec((C, Cr), lambda i: (0, 0)),
            pl.BlockSpec((Cr, C), lambda i: (0, 0)),
        ],
        out_specs=pl.BlockSpec((N, C), lambda i: (0, 0)),
    )(pooled, w1t, w2t)

    return out.reshape(N, C, 1, 1)


def _reference(x, w1, w2):
    # Pure-JAX reference of the PyTorch forward for correctness checking.
    N, C, H, W = x.shape
    Cr = w1.shape[0]
    avg = jnp.mean(x, axis=(2, 3))                     # (N, C)
    h = jnp.maximum(avg @ w1.reshape(Cr, C).T, 0.0)    # (N, Cr)
    out = jax.nn.sigmoid(h @ w2.reshape(C, Cr).T)      # (N, C)
    return out.reshape(N, C, 1, 1)


if __name__ == "__main__":
    key = jax.random.PRNGKey(0)
    kx, k1, k2, kx2, k3, k4, kx3 = jax.random.split(key, 7)

    # --- Case 1: small map, single HW tile, batch-blocked pooling -----------
    N, C, reduction = 2, 64, 16
    Cr = C // reduction
    w1 = jax.random.normal(k1, (Cr, C, 1, 1), dtype=jnp.float32) * (2.0 / C) ** 0.5
    w2 = jax.random.normal(k2, (C, Cr, 1, 1), dtype=jnp.float32) * (2.0 / Cr) ** 0.5

    H, W = 16, 16
    x = jax.random.normal(kx, (N, C, H, W), dtype=jnp.float32)
    out = jax.block_until_ready(channel_attention(x, w1, w2))
    ref = _reference(x, w1, w2)
    assert out.shape == (N, C, 1, 1)
    assert jnp.allclose(out, ref, atol=1e-5, rtol=1e-5)

    # --- Case 2: ragged HW, multi-tile accumulation + masked last tile ------
    H2, W2 = 18, 14  # HW = 252, tile 128 -> remainder 124 (masked, last tile)
    x2 = jax.random.normal(kx2, (N, C, H2, W2), dtype=jnp.float32)
    out2 = jax.block_until_ready(channel_attention(x2, w1, w2, tile_hw=128))
    ref2 = _reference(x2, w1, w2)
    assert out2.shape == (N, C, 1, 1)
    assert jnp.allclose(out2, ref2, atol=1e-5, rtol=1e-5)

    # --- Case 3: N=1 inference path -> channel-split parallel grid ----------
    C3 = 256
    Cr3 = C3 // reduction
    w1b = jax.random.normal(k3, (Cr3, C3, 1, 1), dtype=jnp.float32) * (2.0 / C3) ** 0.5
    w2b = jax.random.normal(k4, (C3, Cr3, 1, 1), dtype=jnp.float32) * (2.0 / Cr3) ** 0.5
    x3 = jax.random.normal(kx3, (1, C3, 16, 16), dtype=jnp.float32)
    out3 = jax.block_until_ready(channel_attention(x3, w1b, w2b))
    ref3 = _reference(x3, w1b, w2b)
    assert out3.shape == (1, C3, 1, 1)
    assert jnp.allclose(out3, ref3, atol=1e-5, rtol=1e-5)

    print("KERNEL_OK")
</pallas_src>

<mosaic_0001>
module attributes {stable_mosaic.version = 11 : i64} {
  func.func @_global_avg_pool_kernel(%arg0: i32, %arg1: i32, %arg2: i32, %arg3: memref<2x64x256xf32, #tpu.memory_space<vmem>>, %arg4: memref<2x64xf32, #tpu.memory_space<vmem>>, %arg5: memref<2x64xf32, #tpu.memory_space<vmem>>) attributes {dimension_semantics = [#tpu.dimension_semantics<parallel>, #tpu.dimension_semantics<parallel>, #tpu.dimension_semantics<arbitrary>], iteration_bounds = array<i64: 1, 1, 1>, scalar_prefetch = 0 : i64, scratch_operands = 1 : i64, tpu.core_type = #tpu.core_type<tc>, window_params = [{transform_indices = @transform_0, window_bounds = array<i64: 2, 64, 256>}, {transform_indices = @transform_1, window_bounds = array<i64: 2, 64>}]} {
    %c0_i32 = arith.constant 0 : i32
    %0 = arith.cmpi eq, %arg2, %c0_i32 : i32
    %1 = arith.extui %0 : i1 to i32
    %c0_i32_0 = arith.constant 0 : i32
    %2 = arith.cmpi ne, %1, %c0_i32_0 : i32
    scf.if %2 {
      %cst_9 = arith.constant 0.000000e+00 : f32
      %11 = vector.broadcast %cst_9 : f32 to vector<2x64xf32>
      %c0_10 = arith.constant 0 : index
      %c0_11 = arith.constant 0 : index
      %12 = vector.load %arg5[%c0_10, %c0_11] : memref<2x64xf32, #tpu.memory_space<vmem>>, vector<2x64xf32>
      tpu.vector_store %arg5[%c0_10, %c0_11], %11 {strides = array<i32>} : memref<2x64xf32, #tpu.memory_space<vmem>>, vector<2x64xf32>,
    } else {
    }
    %c0 = arith.constant 0 : index
    %c0_1 = arith.constant 0 : index
    %c0_2 = arith.constant 0 : index
    %3 = vector.load %arg3[%c0, %c0_1, %c0_2] : memref<2x64x256xf32, #tpu.memory_space<vmem>>, vector<2x64x256xf32>
    %c0_3 = arith.constant 0 : index
    %c0_4 = arith.constant 0 : index
    %4 = vector.load %arg5[%c0_3, %c0_4] : memref<2x64xf32, #tpu.memory_space<vmem>>, vector<2x64xf32>
    %cst = arith.constant dense<0.000000e+00> : vector<2x64xf32>
    %5 = vector.multi_reduction <add>, %3, %cst [2] : vector<2x64x256xf32> to vector<2x64xf32>
    %6 = arith.addf %4, %5 : vector<2x64xf32>
    %c0_5 = arith.constant 0 : index
    %c0_6 = arith.constant 0 : index
    %7 = vector.load %arg5[%c0_5, %c0_6] : memref<2x64xf32, #tpu.memory_space<vmem>>, vector<2x64xf32>
    tpu.vector_store %arg5[%c0_5, %c0_6], %6 {strides = array<i32>} : memref<2x64xf32, #tpu.memory_space<vmem>>, vector<2x64xf32>,
    %c0_i32_7 = arith.constant 0 : i32
    %8 = arith.cmpi eq, %arg2, %c0_i32_7 : i32
    %9 = arith.extui %8 : i1 to i32
    %c0_i32_8 = arith.constant 0 : i32
    %10 = arith.cmpi ne, %9, %c0_i32_8 : i32
    scf.if %10 {
      %c0_9 = arith.constant 0 : index
      %c0_10 = arith.constant 0 : index
      %11 = vector.load %arg5[%c0_9, %c0_10] : memref<2x64xf32, #tpu.memory_space<vmem>>, vector<2x64xf32>
      %cst_11 = arith.constant 3.906250e-03 : f32
      %12 = vector.broadcast %cst_11 : f32 to vector<2x64xf32>
      %13 = arith.mulf %11, %12 : vector<2x64xf32>
      %c0_12 = arith.constant 0 : index
      %c0_13 = arith.constant 0 : index
      %14 = vector.load %arg4[%c0_12, %c0_13] : memref<2x64xf32, #tpu.memory_space<vmem>>, vector<2x64xf32>
      tpu.vector_store %arg4[%c0_12, %c0_13], %13 {strides = array<i32>} : memref<2x64xf32, #tpu.memory_space<vmem>>, vector<2x64xf32>,
    } else {
    }
    return
  }
  func.func @transform_0(%arg0: i32, %arg1: i32, %arg2: i32) -> (i32, i32, i32) {
    %c0_i32 = arith.constant 0 : i32
    return %arg0, %arg1, %arg2 : i32, i32, i32
  }
  func.func @transform_1(%arg0: i32, %arg1: i32, %arg2: i32) -> (i32, i32) {
    %c0_i32 = arith.constant 0 : i32
    return %arg0, %arg1 : i32, i32
  }
}

</mosaic_0001>

<bundles_post_ra>
// kernel: tpu_custom_call.1
= control target key start
LH: loop header
LB: loop body
LE: loop exit
PB: predicated region body
PF: predicated region fallthrough
CT: control target
= control target key end

     0   :  { %6 = vsyncpa [#allocation4], 0  ;;  %s352_s0 = inlined_call_operand.hbm [shape: f32[2,64,256], index: 0, kind: input, shape index: {}]   ;;  %s353_s1 = inlined_call_operand.hbm [shape: f32[2,64], index: 1, kind: output, shape index: {}]  }
   0x1   :  { %7 = vsyncpa [#allocation5], 0  ;;  %s300_s6 = smov [#allocation3]   ;;  %s252_s10 = scalar_lea.hbm %s352_s0, 4096 }
   0x2   :  { %s13_s7 = sshll.u32 %s300_s6, 4  ;;  %p253_p0 = scmp.ne.s32.totalorder %s352_s0, %s252_s10  ;;  %s14_s7 = int_to_ptr.vmem [resolvable:$true] %s13_s7 }
   0x3   :  { %p256_p1 = scmp.lt.u32.totalorder %s252_s10, %s352_s0 }
   0x5   :  { %p258_p2 = pnand %p256_p1, %p253_p0 }
   0x7   :  { %261 = shalt.err (!%p258_p2)
}
   0x8   :  { %s262_s15 = scalar_lea.vmem %s14_s7, 4096  ;;  %p267_p4 = scmp.lt.s32.totalorder %s14_s7, %s14_s7 }
   0x9   :  { %p263_p3 = scmp.ne.s32.totalorder %s14_s7, %s262_s15  ;;  %p268_p5 = scmp.lt.s32.totalorder %s262_s15, %s262_s15 }
   0xb   :  { %p269_p6 = por %p268_p5, %p267_p4 }
   0xd   :  { %p270_p7 = pnand %p269_p6, %p263_p3 }
   0xf   :  { %273 = shalt.err (!%p270_p7)
}
  0x10   :  { %s301_s16 = smov 256   ;;  %s302_s17 = smov 16  }
  0x11   :  { %19 = dma.hbm_to_vmem [thread:$0]  %s352_s0, 4096, %s14_s7, [#allocation4], %s301_s16, %s301_s16, %s302_s17  }
  0x12   :  { %296 = dma.done.wait [#allocation4], 4096  }
  0x13   :  { %297 = vsyncadd [#allocation4], 4294963200  ;;  %v45_v0 = vld [vmem:[#allocation3 + $0x80] sm:$0xff]  ;;  %v46_v1 = vld [vmem:[#allocation3 + $0x88] sm:$0xff]  ;;  %vm27_vm0 = vcmask 517120   ;;  %v303_v48 = vmov 0.0   ;;  %v126_v53 = vlaneseq }
  0x14   :  { %v29_v2 = vld [vmem:[#allocation3] sm:$0xff]  ;;  %v86_v3 = vadd.f32 %v46_v1, %v45_v0  ;;  %v30_v4 = vld [vmem:[#allocation3 + $0x8] sm:$0xff]  ;;  %v47_v5 = vld [vmem:[#allocation3 + $0x90] sm:$0xff]  ;;  %28 = vst.msk [vmem:[#allocation2] sm:$0x3] %vm27_vm0, %v303_v48  ;;  %vm137_vm1 = vcmask 130112  }
  0x15   :  { %v48_v6 = vld [vmem:[#allocation3 + $0x98] sm:$0xff]  ;;  %v62_v7 = vadd.f32 %v30_v4, %v29_v2  ;;  %v31_v8 = vld [vmem:[#allocation3 + $0x10] sm:$0xff]  ;;  %v49_v12 = vld [vmem:[#allocation3 + $0xa0] sm:$0xff]  ;;  %v127_v56 = vand.u32 127, %v126_v53  ;;  %v129_v61 = vshrl.u32 %v126_v53, 7  ;;  %vm144_vm2 = vcmask 195712  }
  0x16   :  { %v32_v9 = vld [vmem:[#allocation3 + $0x18] sm:$0xff]  ;;  %87 = vadd.xlane.f32.xlu1 %v86_v3  ;;  %v89_v10 = vadd.f32 %v48_v6, %v47_v5  ;;  %v50_v13 = vld [vmem:[#allocation3 + $0xa8] sm:$0xff]  ;;  %v33_v14 = vld [vmem:[#allocation3 + $0x20] sm:$0xff]  ;;  %vm151_vm3 = vcmask 261312   ;;  %vm158_vm4 = vcmask 326912   ;;  %vm165_vm5 = vcmask 392512  }
  0x17   :  { %63 = vadd.xlane.f32.xlu0 %v62_v7  ;;  %v65_v11 = vadd.f32 %v32_v9, %v31_v8  ;;  %v34_v15 = vld [vmem:[#allocation3 + $0x28] sm:$0xff]  ;;  %v92_v16 = vadd.f32 %v50_v13, %v49_v12  ;;  %v51_v18 = vld [vmem:[#allocation3 + $0xb0] sm:$0xff]  ;;  %v52_v19 = vld [vmem:[#allocation3 + $0xb8] sm:$0xff]  ;;  %v132_v58 = vadd.s32 4294967288, %v127_v56  ;;  %v139_v60 = vadd.s32 4294967280, %v127_v56  ;;  %s304_s0 = smov [#allocation6]  }
  0x18   :  { %v68_v17 = vadd.f32 %v34_v15, %v33_v14  ;;  %v35_v20 = vld [vmem:[#allocation3 + $0x30] sm:$0xff]  ;;  %v36_v21 = vld [vmem:[#allocation3 + $0x38] sm:$0xff]  ;;  %v95_v22 = vadd.f32 %v52_v19, %v51_v18  ;;  %v53_v24 = vld [vmem:[#allocation3 + $0xc0] sm:$0xff]  ;;  %v146_v62 = vadd.s32 4294967272, %v127_v56  ;;  %v153_v63 = vadd.s32 4294967264, %v127_v56  ;;  %s238_s20 = sshll.u32 %s304_s0, 4  ;;  %s239_s20 = int_to_ptr.vmem [resolvable:$true] %s238_s20 }
  0x19   :  { %v71_v23 = vadd.f32 %v36_v21, %v35_v20  ;;  %v54_v25 = vld [vmem:[#allocation3 + $0xc8] sm:$0xff]  ;;  %v37_v26 = vld [vmem:[#allocation3 + $0x40] sm:$0xff]  ;;  %v55_v30 = vld [vmem:[#allocation3 + $0xd0] sm:$0xff]  ;;  %v135_v1 = vsub.s32 %v132_v58, %v129_v61  ;;  %v160_v3 = vadd.s32 4294967256, %v127_v56  ;;  %v142_v4 = vsub.s32 %v139_v60, %v129_v61  ;;  %s274_s21 = scalar_lea.vmem %s239_s20, 32  ;;  %p279_p9 = scmp.lt.s32.totalorder %s239_s20, %s239_s20 }
  0x1a   :  { %90 = vadd.xlane.f32.xlu1 %v89_v10  ;;  %v38_v27 = vld [vmem:[#allocation3 + $0x48] sm:$0xff]  ;;  %v98_v28 = vadd.f32 %v54_v25, %v53_v24  ;;  %v56_v31 = vld [vmem:[#allocation3 + $0xd8] sm:$0xff]  ;;  %v39_v32 = vld [vmem:[#allocation3 + $0x50] sm:$0xff]  ;;  %v167_v5 = vadd.s32 4294967248, %v127_v56  ;;  %v130_v6 = vsub.s32 %v127_v56, %v129_v61  ;;  %v149_v7 = vsub.s32 %v146_v62, %v129_v61  ;;  %p275_p8 = scmp.ne.s32.totalorder %s239_s20, %s274_s21  ;;  %p280_p10 = scmp.lt.s32.totalorder %s274_s21, %s274_s21 }
  0x1b   :  { %66 = vadd.xlane.f32.xlu0 %v65_v11  ;;  %v74_v29 = vadd.f32 %v38_v27, %v37_v26  ;;  %v40_v33 = vld [vmem:[#allocation3 + $0x58] sm:$0xff]  ;;  %v101_v34 = vadd.f32 %v56_v31, %v55_v30  ;;  %v57_v36 = vld [vmem:[#allocation3 + $0xe0] sm:$0xff]  ;;  %v58_v37 = vld [vmem:[#allocation3 + $0xe8] sm:$0xff]  ;;  %v156_v8 = vsub.s32 %v153_v63, %v129_v61  ;;  %v163_v11 = vsub.s32 %v160_v3, %v129_v61 }
  0x1c   :  { %v77_v35 = vadd.f32 %v40_v33, %v39_v32  ;;  %v41_v38 = vld [vmem:[#allocation3 + $0x60] sm:$0xff]  ;;  %v42_v39 = vld [vmem:[#allocation3 + $0x68] sm:$0xff]  ;;  %v104_v40 = vadd.f32 %v58_v37, %v57_v36  ;;  %v59_v42 = vld [vmem:[#allocation3 + $0xf0] sm:$0xff]  ;;  %v174_v13 = vadd.s32 4294967240, %v127_v56  ;;  %vm172_vm6 = vcmask 458112   ;;  %p281_p11 = por %p280_p10, %p279_p9 }
  0x1d   :  { %v80_v41 = vadd.f32 %v42_v39, %v41_v38  ;;  %v60_v43 = vld [vmem:[#allocation3 + $0xf8] sm:$0xff]  ;;  %v43_v44 = vld [vmem:[#allocation3 + $0x70] sm:$0xff]  ;;  %vm179_vm7 = vcmask 523712   ;;  %vm220_vm8 = vcmask 1041409  }
  0x1e   :  { %93 = vadd.xlane.f32.xlu1 %v92_v16  ;;  %v44_v45 = vld [vmem:[#allocation3 + $0x78] sm:$0xff]  ;;  %v107_v46 = vadd.f32 %v60_v43, %v59_v42  ;;  %v170_v16 = vsub.s32 %v167_v5, %v129_v61  ;;  %p282_p12 = pnand %p281_p11, %p275_p8 }
  0x1f   :  { %69 = vadd.xlane.f32.xlu0 %v68_v17  ;;  %v83_v47 = vadd.f32 %v44_v45, %v43_v44  ;;  %v61_v48 = vld [vmem:[#allocation2] sm:$0x3] }
  0x22   :  { %96 = vadd.xlane.f32.xlu1 %v95_v22 }
  0x23   :  { %72 = vadd.xlane.f32.xlu0 %v71_v23 }
  0x26   :  { %99 = vadd.xlane.f32.xlu1 %v98_v28  ;;  %v177_v28 = vsub.s32 %v174_v13, %v129_v61 }
  0x27   :  { %75 = vadd.xlane.f32.xlu0 %v74_v29 }
  0x2a   :  { %102 = vadd.xlane.f32.xlu1 %v101_v34 }
  0x2b   :  { %78 = vadd.xlane.f32.xlu0 %v77_v35 }
  0x2e   :  { %105 = vadd.xlane.f32.xlu1 %v104_v40 }
  0x2f   :  { %81 = vadd.xlane.f32.xlu0 %v80_v41 }
  0x32   :  { %108 = vadd.xlane.f32.xlu1 %v107_v46 }
  0x33   :  { %84 = vadd.xlane.f32.xlu0 %v83_v47 }
  0xa3   :  { %v88_v49 = vpop.xlane.xlu1 %87 }
  0xa4   :  { %v64_v50 = vpop.xlane.xlu0 %63  ;;  %v184_v17 = vrot.slane %v88_v49, %v130_v6 }
  0xa5   :  { %v131_v20 = vrot.slane %v64_v50, %v130_v6 }
  0xa7   :  { %v91_v51 = vpop.xlane.xlu1 %90 }
  0xa8   :  { %v67_v52 = vpop.xlane.xlu0 %66  ;;  %v188_v10 = vrot.slane %v91_v51, %v135_v1 }
  0xa9   :  { %v136_v14 = vrot.slane %v67_v52, %v135_v1 }
  0xaa   :  { %v189_v24 = vsel %vm137_vm1, %v188_v10, %v184_v17 }
  0xab   :  { %v94_v54 = vpop.xlane.xlu1 %93  ;;  %v138_v29 = vsel %vm137_vm1, %v136_v14, %v131_v20 }
  0xac   :  { %v70_v55 = vpop.xlane.xlu0 %69  ;;  %v193_v15 = vrot.slane %v94_v54, %v142_v4 }
  0xad   :  { %v143_v18 = vrot.slane %v70_v55, %v142_v4 }
  0xae   :  { %v194_v30 = vsel %vm144_vm2, %v193_v15, %v189_v24 }
  0xaf   :  { %v97_v57 = vpop.xlane.xlu1 %96  ;;  %v145_v33 = vsel %vm144_vm2, %v143_v18, %v138_v29 }
  0xb0   :  { %v73_v59 = vpop.xlane.xlu0 %72  ;;  %v198_v19 = vrot.slane %v97_v57, %v149_v7 }
  0xb1   :  { %v150_v21 = vrot.slane %v73_v59, %v149_v7 }
  0xb2   :  { %v199_v34 = vsel %vm151_vm3, %v198_v19, %v194_v30 }
  0xb3   :  { %v100_v0 = vpop.xlane.xlu1 %99  ;;  %v152_v36 = vsel %vm151_vm3, %v150_v21, %v145_v33 }
  0xb4   :  { %v76_v2 = vpop.xlane.xlu0 %75  ;;  %v203_v22 = vrot.slane %v100_v0, %v156_v8 }
  0xb5   :  { %v157_v25 = vrot.slane %v76_v2, %v156_v8 }
  0xb6   :  { %v204_v37 = vsel %vm158_vm4, %v203_v22, %v199_v34 }
  0xb7   :  { %v103_v9 = vpop.xlane.xlu1 %102  ;;  %v159_v39 = vsel %vm158_vm4, %v157_v25, %v152_v36 }
  0xb8   :  { %v79_v12 = vpop.xlane.xlu0 %78  ;;  %v208_v26 = vrot.slane %v103_v9, %v163_v11 }
  0xb9   :  { %v164_v31 = vrot.slane %v79_v12, %v163_v11 }
  0xba   :  { %v209_v40 = vsel %vm165_vm5, %v208_v26, %v204_v37 }
  0xbb   :  { %v106_v23 = vpop.xlane.xlu1 %105  ;;  %v166_v43 = vsel %vm165_vm5, %v164_v31, %v159_v39 }
  0xbc   :  { %v82_v27 = vpop.xlane.xlu0 %81  ;;  %v213_v32 = vrot.slane %v106_v23, %v170_v16 }
  0xbd   :  { %v171_v35 = vrot.slane %v82_v27, %v170_v16 }
  0xbe   :  { %v214_v44 = vsel %vm172_vm6, %v213_v32, %v209_v40 }
  0xbf   :  { %v109_v38 = vpop.xlane.xlu1 %108  ;;  %v173_v46 = vsel %vm172_vm6, %v171_v35, %v166_v43 }
  0xc0   :  { %v218_v41 = vrot.slane %v109_v38, %v177_v28  ;;  %v85_v42 = vpop.xlane.xlu0 %84 }
  0xc1   :  { %v178_v45 = vrot.slane %v85_v42, %v177_v28 }
  0xc2   :  { %v219_v47 = vsel %vm179_vm7, %v218_v41, %v214_v44 }
  0xc3   :  { %v180_v49 = vsel %vm179_vm7, %v178_v45, %v173_v46 }
  0xc4   :  { %v221_v50 = vsel %vm220_vm8, %v219_v47, %v180_v49 }
  0xc5   :  { %v223_v51 = vadd.f32 %v221_v50, %v61_v48 }
  0xc7   :  { %225 = vst.msk [vmem:[#allocation2] sm:$0x3] %vm27_vm0, %v223_v51 }
  0xce   :  { %v229_v52 = vld [vmem:[#allocation2] sm:$0x3] }
  0xcf   :  { %v230_v53 = vmul.f32 0.00390625, %v229_v52 }
  0xd1   :  { %231 = vst.msk [vmem:[#allocation6] sm:$0x3] %vm27_vm0, %v230_v53 }
  0xd2   :  { %285 = shalt.err (!%p282_p12)
}
  0xd3   :  { %s286_s24 = scalar_lea.hbm %s353_s1, 32 }
  0xd4   :  { %p287_p13 = scmp.ne.s32.totalorder %s353_s1, %s286_s24  ;;  %p290_p0 = scmp.lt.u32.totalorder %s286_s24, %s353_s1 }
  0xd6   :  { %p292_p1 = pnand %p290_p0, %p287_p13 }
  0xd8   :  { %295 = shalt.err (!%p292_p1)
}
  0xd9   :  { %241 = dma.vmem_to_hbm [thread:$0]  %s239_s20, 32, %s353_s1, [#allocation5]  }
  0xda   :  { %298 = dma.done.wait [#allocation5], 32  }
  0xdb   :  { %299 = vsyncadd [#allocation5], 4294967264 }
  0xdc   :  { %245 = vsyncpa [#allocation4], 1 }
  0xdd   :  { %246 = vsyncpa [#allocation5], 1 }

</bundles_post_ra>
